<compile_context>
chip_gen: v6e
topology: v6e:2x2x1
jax: 0.10.0
libtpu: 0.0.40
codegen_flags: <defaults>
</compile_context>

<pallas_src>
import functools

import jax
import jax.numpy as jnp
import numpy as np
from jax.experimental import pallas as pl
from jax.experimental.pallas import tpu as pltpu


# ----------------------------------------------------------------------------
# Parameter prep: K-split + zero-pad weights.  Done ONCE outside jit.
# Exact for ReLU nets: padded biases are 0, padded K rows multiply zero
# activation columns of the previous (padded) layer.
# ----------------------------------------------------------------------------
def _round_up(x, m):
    return ((x + m - 1) // m) * m


def prepare_params_for_tpu(params, *, state_size, n_future_covariates,
                           n_horizons, local_context_size, global_context_size):
    H, L, G, C = (n_horizons, local_context_size, global_context_size,
                  n_future_covariates)

    def pad2d(x, rows, cols):
        x = jnp.asarray(x, jnp.float32)
        return jnp.pad(x, ((0, rows - x.shape[0]), (0, cols - x.shape[1])))

    (w0, b0), (w1, b1), (w2, b2) = params["global"]
    (v0, c0), (v1, c1) = params["local"]

    # ---- Global MLP.  Layer 0 is K-split into state rows / covariate rows. --
    n0 = _round_up(w0.shape[1], 128)
    w0s = pad2d(w0[:state_size], state_size, n0)             # (S, n0)
    w0c = pad2d(w0[state_size:], _round_up(C * H, 8), n0)    # (C*H pad8, n0)
    b0p = pad2d(b0, 1, n0)
    n1 = _round_up(w1.shape[1], 128)
    w1p = pad2d(w1, n0, n1)
    b1p = pad2d(b1, 1, n1)
    n2 = _round_up(w2.shape[1], 128)
    w2p = pad2d(w2, n1, n2)
    b2p = pad2d(b2, 1, n2)

    # ---- Local MLP.  Layer 0 K-split: global ctx / local ctx / covariates. --
    m0 = _round_up(v0.shape[1], 128)
    v0g = pad2d(v0[:G], G, m0)                               # (G, m0)
    v0t = pad2d(v0[G:G + L], L, m0)                          # (L, m0)
    v0c = pad2d(v0[G + L:], _round_up(C, 8), m0)             # (C pad8, m0)
    c0p = pad2d(c0, 1, m0)
    m1 = _round_up(v1.shape[1], 128)
    v1p = pad2d(v1, m0, m1)
    c1p = pad2d(c1, 1, m1)

    return dict(w0s=w0s, w0c=w0c, b0=b0p, w1=w1p, b1=b1p, w2=w2p, b2=b2p,
                v0g=v0g, v0ts=v0t, v0cov=v0c, c0=c0p, v1=v1p, c1=c1p)


_WEIGHT_ORDER = ("w0s", "w0c", "b0", "w1", "b1", "w2", "b2",
                 "v0g", "v0ts", "v0cov", "c0", "v1", "c1")


# ----------------------------------------------------------------------------
# Fused Pallas kernel: global MLP -> shared/per-horizon partial matmuls ->
# local MLP, one lane-dense (B, 128) output tile per horizon.  No concats.
# ----------------------------------------------------------------------------
def decoder_fused_kernel(state_ref, cov_flat_ref, cov_stk_ref,
                         w0s_ref, w0c_ref, b0_ref, w1_ref, b1_ref,
                         w2_ref, b2_ref,
                         v0g_ref, v0ts_ref, v0cov_ref, c0_ref, v1_ref, c1_ref,
                         out_ref, *, n_horizons, local_ctx, global_ctx):
    H, L, G = n_horizons, local_ctx, global_ctx
    B = out_ref.shape[1]
    f32 = jnp.float32

    # ---- Global MLP: K-split first layer (replaces cat([state, covs], 1)) ---
    h = (jnp.dot(state_ref[...], w0s_ref[...], preferred_element_type=f32)
         + jnp.dot(cov_flat_ref[...], w0c_ref[...], preferred_element_type=f32)
         + b0_ref[...])
    h = jnp.maximum(h, 0.0)
    h = jnp.dot(h, w1_ref[...], preferred_element_type=f32) + b1_ref[...]
    h = jnp.maximum(h, 0.0)
    mlp_out = (jnp.dot(h, w2_ref[...], preferred_element_type=f32)
               + b2_ref[...])                                # (B, n2>=G+H*L)

    # ---- Local MLP first layer as K-split partial matmuls -------------------
    # Shared global-context term: computed ONCE, reused for every horizon.
    z_shared = (jnp.dot(mlp_out[:, :G], v0g_ref[...], preferred_element_type=f32)
                + c0_ref[...])                               # (B, m0)
    # Covariate term for ALL horizons in one stacked matmul.
    cov_contrib = jnp.dot(cov_stk_ref[...], v0cov_ref[...],
                          preferred_element_type=f32)        # (H*B, m0)

    v0ts = v0ts_ref[...]
    v1 = v1_ref[...]
    c1 = c1_ref[...]
    for hz in range(H):                                      # static unroll
        c_ts = mlp_out[:, G + hz * L: G + (hz + 1) * L]      # (B, L) static slice
        z = (z_shared
             + jnp.dot(c_ts, v0ts, preferred_element_type=f32)
             + cov_contrib[hz * B:(hz + 1) * B, :])
        z = jnp.maximum(z, 0.0)
        # Full (B, m1) lane-dense tile store per horizon (unmasked vst).
        out_ref[hz] = jnp.dot(z, v1, preferred_element_type=f32) + c1


# ----------------------------------------------------------------------------
# Wrapper (DecoderNet.forward)
# ----------------------------------------------------------------------------
@functools.partial(jax.jit, static_argnames=("n_horizons", "local_ctx",
                                             "global_ctx", "n_quantiles"))
def decoder_net_forward(state, future_covariates, tpu_params, *, n_horizons,
                        local_ctx, global_ctx, n_quantiles):
    B = state.shape[0]
    C = future_covariates.shape[0]
    H, L, G = n_horizons, local_ctx, global_ctx

    # Tiny layout glue on the (C, B, H) covariate tensor (fused by XLA):
    #   cov_flat: cov-major (B, C*H) operand for the global MLP
    #   cov_stk : horizon-stacked (H*B, C) operand for the local MLP
    fc = future_covariates[:, :, :H].astype(jnp.float32)
    cov_flat = jnp.transpose(fc, (1, 0, 2)).reshape(B, C * H)
    cov_stk = jnp.transpose(fc, (2, 1, 0)).reshape(H * B, C)

    # Zero-pad contraction dims to the padded weight K dims (exact: zero rows).
    state = state.astype(jnp.float32)
    w0s, w0c, v0cov = tpu_params["w0s"], tpu_params["w0c"], tpu_params["v0cov"]
    if state.shape[1] < w0s.shape[0]:
        state = jnp.pad(state, ((0, 0), (0, w0s.shape[0] - state.shape[1])))
    if cov_flat.shape[1] < w0c.shape[0]:
        cov_flat = jnp.pad(cov_flat,
                           ((0, 0), (0, w0c.shape[0] - cov_flat.shape[1])))
    if cov_stk.shape[1] < v0cov.shape[0]:
        cov_stk = jnp.pad(cov_stk,
                          ((0, 0), (0, v0cov.shape[0] - cov_stk.shape[1])))

    m1 = tpu_params["c1"].shape[1]
    weights = [tpu_params[k] for k in _WEIGHT_ORDER]

    kern = functools.partial(decoder_fused_kernel, n_horizons=H,
                             local_ctx=L, global_ctx=G)
    vmem_spec = pl.BlockSpec(memory_space=pltpu.MemorySpace.VMEM)
    out_pad = pl.pallas_call(
        kern,
        out_shape=jax.ShapeDtypeStruct((H, B, m1), jnp.float32),
        in_specs=[vmem_spec] * (3 + len(weights)),
        out_specs=vmem_spec,
    )(state, cov_flat, cov_stk, *weights)

    # Free per-tile slice: (H, B, m1) -> (H, B, n_quantiles).
    return out_pad[:, :, :n_quantiles]


# ----------------------------------------------------------------------------
# Pure-JAX reference (mirrors the PyTorch module semantics, unpadded params)
# ----------------------------------------------------------------------------
def decoder_net_reference(state, future_covariates, params, *, n_horizons,
                          local_ctx, global_ctx):
    hp = jax.lax.Precision.HIGHEST
    mm = lambda a, b: jnp.dot(a, b, precision=hp)
    B = state.shape[0]
    C = future_covariates.shape[0]
    H, L, G = n_horizons, local_ctx, global_ctx
    (w0, b0), (w1, b1), (w2, b2) = params["global"]
    (v0, c0), (v1, c1) = params["local"]

    covs_flat = jnp.concatenate(
        [future_covariates[i, :, :H] for i in range(C)], axis=1)
    x = jnp.concatenate([state, covs_flat], axis=1)
    h = jnp.maximum(mm(x, w0) + b0, 0.0)
    h = jnp.maximum(mm(h, w1) + b1, 0.0)
    mlp_out = mm(h, w2) + b2

    c_a = mlp_out[:, :G]
    c_ts = mlp_out[:, G:].reshape(B, H, L).transpose(1, 0, 2)

    rets = []
    for hz in range(H):
        loc_in = jnp.concatenate(
            [c_a, c_ts[hz], future_covariates[:, :, hz].T], axis=1)
        z = jnp.maximum(mm(loc_in, v0) + c0, 0.0)
        rets.append(mm(z, v1) + c1)
    return jnp.stack(rets, axis=0)


# ----------------------------------------------------------------------------
# Deterministic parameter init (PyTorch-Linear-style uniform fan-in bound)
# ----------------------------------------------------------------------------
def init_linear(key, fan_in, fan_out):
    kw, kb = jax.random.split(key)
    lim = 1.0 / np.sqrt(fan_in)
    w = jax.random.uniform(kw, (fan_in, fan_out), jnp.float32, -lim, lim)
    b = jax.random.uniform(kb, (1, fan_out), jnp.float32, -lim, lim)
    return w, b


if __name__ == "__main__":
    # Module hyperparameters (small shapes).
    batch = 8
    state_size = 16
    n_future_covariates = 3
    n_quantiles = 4
    n_horizons = 6
    local_context_size = 16
    global_context_size = 32
    n_global_layers = 3
    n_local_layers = 2

    # Layer sizes exactly as in the PyTorch module.
    g_in = state_size + n_future_covariates * n_horizons
    g_out = n_horizons * local_context_size + global_context_size
    g_sizes = np.linspace(g_in, g_out, n_global_layers, dtype=int)   # [34,81,128]
    l_in = global_context_size + local_context_size + n_future_covariates
    l_sizes = np.linspace(l_in, n_quantiles, n_local_layers, dtype=int)  # [51,4]

    key = jax.random.PRNGKey(0)
    keys = jax.random.split(key, 8)

    # Global MLP: g_in -> 34 -> 81 -> 128 ; Local MLP: 51 -> 51 -> 4.
    g_params, prev = [], g_in
    for i, sz in enumerate(g_sizes):
        g_params.append(init_linear(keys[i], prev, int(sz)))
        prev = int(sz)
    l_params, prev = [], l_in
    for i, sz in enumerate(l_sizes):
        l_params.append(init_linear(keys[3 + i], prev, int(sz)))
        prev = int(sz)
    params = {"global": tuple(g_params), "local": tuple(l_params)}

    # One-time parameter prep (outside jit): K-split + lane-align weights.
    tpu_params = prepare_params_for_tpu(
        params, state_size=state_size, n_future_covariates=n_future_covariates,
        n_horizons=n_horizons, local_context_size=local_context_size,
        global_context_size=global_context_size)

    # Example inputs (standardized covariates: (n_cov, batch, n_horizons)).
    state = jax.random.normal(keys[6], (batch, state_size), jnp.float32)
    future_covariates = jax.random.normal(
        keys[7], (n_future_covariates, batch, n_horizons), jnp.float32)

    out = decoder_net_forward(
        state, future_covariates, tpu_params,
        n_horizons=n_horizons, local_ctx=local_context_size,
        global_ctx=global_context_size, n_quantiles=n_quantiles)
    jax.block_until_ready(out)

    ref = decoder_net_reference(
        state, future_covariates, params,
        n_horizons=n_horizons, local_ctx=local_context_size,
        global_ctx=global_context_size)

    assert out.shape == (n_horizons, batch, n_quantiles), out.shape
    np.testing.assert_allclose(np.asarray(out), np.asarray(ref),
                               rtol=1e-3, atol=1e-3)
    print("KERNEL_OK")
</pallas_src>

<mosaic_0001>
module attributes {stable_mosaic.version = 11 : i64} {
  func.func @decoder_fused_kernel(%arg0: memref<8x16xf32, #tpu.memory_space<vmem>>, %arg1: memref<8x24xf32, #tpu.memory_space<vmem>>, %arg2: memref<48x8xf32, #tpu.memory_space<vmem>>, %arg3: memref<16x128xf32, #tpu.memory_space<vmem>>, %arg4: memref<24x128xf32, #tpu.memory_space<vmem>>, %arg5: memref<1x128xf32, #tpu.memory_space<vmem>>, %arg6: memref<128x128xf32, #tpu.memory_space<vmem>>, %arg7: memref<1x128xf32, #tpu.memory_space<vmem>>, %arg8: memref<128x128xf32, #tpu.memory_space<vmem>>, %arg9: memref<1x128xf32, #tpu.memory_space<vmem>>, %arg10: memref<32x128xf32, #tpu.memory_space<vmem>>, %arg11: memref<16x128xf32, #tpu.memory_space<vmem>>, %arg12: memref<8x128xf32, #tpu.memory_space<vmem>>, %arg13: memref<1x128xf32, #tpu.memory_space<vmem>>, %arg14: memref<128x128xf32, #tpu.memory_space<vmem>>, %arg15: memref<1x128xf32, #tpu.memory_space<vmem>>, %arg16: memref<6x8x128xf32, #tpu.memory_space<vmem>>) attributes {dimension_semantics = [], scalar_prefetch = 0 : i64, scratch_operands = 0 : i64, tpu.core_type = #tpu.core_type<tc>} {
    %c0 = arith.constant 0 : index
    %c0_0 = arith.constant 0 : index
    %0 = vector.load %arg0[%c0, %c0_0] : memref<8x16xf32, #tpu.memory_space<vmem>>, vector<8x16xf32>
    %c0_1 = arith.constant 0 : index
    %c0_2 = arith.constant 0 : index
    %1 = vector.load %arg3[%c0_1, %c0_2] : memref<16x128xf32, #tpu.memory_space<vmem>>, vector<16x128xf32>
    %cst = arith.constant dense<0.000000e+00> : vector<8x128xf32>
    %2 = tpu.matmul %0, %1, %cst {dimension_numbers = #tpu.dot_dimension_numbers<[1], [0], [0], [1], [0, 0, 1, 1], [], []>} : vector<8x16xf32>, vector<16x128xf32>, vector<8x128xf32> -> vector<8x128xf32>
    %c0_3 = arith.constant 0 : index
    %c0_4 = arith.constant 0 : index
    %3 = vector.load %arg1[%c0_3, %c0_4] : memref<8x24xf32, #tpu.memory_space<vmem>>, vector<8x24xf32>
    %c0_5 = arith.constant 0 : index
    %c0_6 = arith.constant 0 : index
    %4 = vector.load %arg4[%c0_5, %c0_6] : memref<24x128xf32, #tpu.memory_space<vmem>>, vector<24x128xf32>
    %cst_7 = arith.constant dense<0.000000e+00> : vector<8x128xf32>
    %5 = tpu.matmul %3, %4, %cst_7 {dimension_numbers = #tpu.dot_dimension_numbers<[1], [0], [0], [1], [0, 0, 1, 1], [], []>} : vector<8x24xf32>, vector<24x128xf32>, vector<8x128xf32> -> vector<8x128xf32>
    %6 = arith.addf %2, %5 : vector<8x128xf32>
    %c0_8 = arith.constant 0 : index
    %c0_9 = arith.constant 0 : index
    %7 = vector.load %arg5[%c0_8, %c0_9] : memref<1x128xf32, #tpu.memory_space<vmem>>, vector<1x128xf32>
    %8 = vector.broadcast %7 : vector<1x128xf32> to vector<8x128xf32>
    %9 = arith.addf %6, %8 : vector<8x128xf32>
    %cst_10 = arith.constant 0.000000e+00 : f32
    %10 = vector.broadcast %cst_10 : f32 to vector<8x128xf32>
    %11 = arith.maximumf %9, %10 : vector<8x128xf32>
    %c0_11 = arith.constant 0 : index
    %c0_12 = arith.constant 0 : index
    %12 = vector.load %arg6[%c0_11, %c0_12] : memref<128x128xf32, #tpu.memory_space<vmem>>, vector<128x128xf32>
    %cst_13 = arith.constant dense<0.000000e+00> : vector<8x128xf32>
    %13 = tpu.matmul %11, %12, %cst_13 {dimension_numbers = #tpu.dot_dimension_numbers<[1], [0], [0], [1], [0, 0, 1, 1], [], []>} : vector<8x128xf32>, vector<128x128xf32>, vector<8x128xf32> -> vector<8x128xf32>
    %c0_14 = arith.constant 0 : index
    %c0_15 = arith.constant 0 : index
    %14 = vector.load %arg7[%c0_14, %c0_15] : memref<1x128xf32, #tpu.memory_space<vmem>>, vector<1x128xf32>
    %15 = vector.broadcast %14 : vector<1x128xf32> to vector<8x128xf32>
    %16 = arith.addf %13, %15 : vector<8x128xf32>
    %cst_16 = arith.constant 0.000000e+00 : f32
    %17 = vector.broadcast %cst_16 : f32 to vector<8x128xf32>
    %18 = arith.maximumf %16, %17 : vector<8x128xf32>
    %c0_17 = arith.constant 0 : index
    %c0_18 = arith.constant 0 : index
    %19 = vector.load %arg8[%c0_17, %c0_18] : memref<128x128xf32, #tpu.memory_space<vmem>>, vector<128x128xf32>
    %cst_19 = arith.constant dense<0.000000e+00> : vector<8x128xf32>
    %20 = tpu.matmul %18, %19, %cst_19 {dimension_numbers = #tpu.dot_dimension_numbers<[1], [0], [0], [1], [0, 0, 1, 1], [], []>} : vector<8x128xf32>, vector<128x128xf32>, vector<8x128xf32> -> vector<8x128xf32>
    %c0_20 = arith.constant 0 : index
    %c0_21 = arith.constant 0 : index
    %21 = vector.load %arg9[%c0_20, %c0_21] : memref<1x128xf32, #tpu.memory_space<vmem>>, vector<1x128xf32>
    %22 = vector.broadcast %21 : vector<1x128xf32> to vector<8x128xf32>
    %23 = arith.addf %20, %22 : vector<8x128xf32>
    %24 = vector.extract_strided_slice %23 {offsets = [0, 0], sizes = [8, 32], strides = [1, 1]} : vector<8x128xf32> to vector<8x32xf32>
    %c0_22 = arith.constant 0 : index
    %c0_23 = arith.constant 0 : index
    %25 = vector.load %arg10[%c0_22, %c0_23] : memref<32x128xf32, #tpu.memory_space<vmem>>, vector<32x128xf32>
    %cst_24 = arith.constant dense<0.000000e+00> : vector<8x128xf32>
    %26 = tpu.matmul %24, %25, %cst_24 {dimension_numbers = #tpu.dot_dimension_numbers<[1], [0], [0], [1], [0, 0, 1, 1], [], []>} : vector<8x32xf32>, vector<32x128xf32>, vector<8x128xf32> -> vector<8x128xf32>
    %c0_25 = arith.constant 0 : index
    %c0_26 = arith.constant 0 : index
    %27 = vector.load %arg13[%c0_25, %c0_26] : memref<1x128xf32, #tpu.memory_space<vmem>>, vector<1x128xf32>
    %28 = vector.broadcast %27 : vector<1x128xf32> to vector<8x128xf32>
    %29 = arith.addf %26, %28 : vector<8x128xf32>
    %c0_27 = arith.constant 0 : index
    %c0_28 = arith.constant 0 : index
    %30 = vector.load %arg2[%c0_27, %c0_28] : memref<48x8xf32, #tpu.memory_space<vmem>>, vector<48x8xf32>
    %c0_29 = arith.constant 0 : index
    %c0_30 = arith.constant 0 : index
    %31 = vector.load %arg12[%c0_29, %c0_30] : memref<8x128xf32, #tpu.memory_space<vmem>>, vector<8x128xf32>
    %cst_31 = arith.constant dense<0.000000e+00> : vector<48x128xf32>
    %32 = tpu.matmul %30, %31, %cst_31 {dimension_numbers = #tpu.dot_dimension_numbers<[1], [0], [0], [1], [0, 0, 1, 1], [], []>} : vector<48x8xf32>, vector<8x128xf32>, vector<48x128xf32> -> vector<48x128xf32>
    %c0_32 = arith.constant 0 : index
    %c0_33 = arith.constant 0 : index
    %33 = vector.load %arg11[%c0_32, %c0_33] : memref<16x128xf32, #tpu.memory_space<vmem>>, vector<16x128xf32>
    %c0_34 = arith.constant 0 : index
    %c0_35 = arith.constant 0 : index
    %34 = vector.load %arg14[%c0_34, %c0_35] : memref<128x128xf32, #tpu.memory_space<vmem>>, vector<128x128xf32>
    %c0_36 = arith.constant 0 : index
    %c0_37 = arith.constant 0 : index
    %35 = vector.load %arg15[%c0_36, %c0_37] : memref<1x128xf32, #tpu.memory_space<vmem>>, vector<1x128xf32>
    %36 = vector.extract_strided_slice %23 {offsets = [0, 32], sizes = [8, 16], strides = [1, 1]} : vector<8x128xf32> to vector<8x16xf32>
    %cst_38 = arith.constant dense<0.000000e+00> : vector<8x128xf32>
    %37 = tpu.matmul %36, %33, %cst_38 {dimension_numbers = #tpu.dot_dimension_numbers<[1], [0], [0], [1], [0, 0, 1, 1], [], []>} : vector<8x16xf32>, vector<16x128xf32>, vector<8x128xf32> -> vector<8x128xf32>
    %38 = arith.addf %29, %37 : vector<8x128xf32>
    %39 = vector.extract_strided_slice %32 {offsets = [0, 0], sizes = [8, 128], strides = [1, 1]} : vector<48x128xf32> to vector<8x128xf32>
    %40 = arith.addf %38, %39 : vector<8x128xf32>
    %cst_39 = arith.constant 0.000000e+00 : f32
    %41 = vector.broadcast %cst_39 : f32 to vector<8x128xf32>
    %42 = arith.maximumf %40, %41 : vector<8x128xf32>
    %cst_40 = arith.constant dense<0.000000e+00> : vector<8x128xf32>
    %43 = tpu.matmul %42, %34, %cst_40 {dimension_numbers = #tpu.dot_dimension_numbers<[1], [0], [0], [1], [0, 0, 1, 1], [], []>} : vector<8x128xf32>, vector<128x128xf32>, vector<8x128xf32> -> vector<8x128xf32>
    %44 = vector.broadcast %35 : vector<1x128xf32> to vector<8x128xf32>
    %45 = arith.addf %43, %44 : vector<8x128xf32>
    %c0_41 = arith.constant 0 : index
    %c0_42 = arith.constant 0 : index
    %c0_43 = arith.constant 0 : index
    %46 = vector.load %arg16[%c0_41, %c0_42, %c0_43] : memref<6x8x128xf32, #tpu.memory_space<vmem>>, vector<1x8x128xf32>
    %47 = vector.shape_cast %46 : vector<1x8x128xf32> to vector<8x128xf32>
    %48 = vector.shape_cast %45 : vector<8x128xf32> to vector<1x8x128xf32>
    tpu.vector_store %arg16[%c0_41, %c0_42, %c0_43], %48 {strides = array<i32>} : memref<6x8x128xf32, #tpu.memory_space<vmem>>, vector<1x8x128xf32>,
    %49 = vector.extract_strided_slice %23 {offsets = [0, 48], sizes = [8, 16], strides = [1, 1]} : vector<8x128xf32> to vector<8x16xf32>
    %cst_44 = arith.constant dense<0.000000e+00> : vector<8x128xf32>
    %50 = tpu.matmul %49, %33, %cst_44 {dimension_numbers = #tpu.dot_dimension_numbers<[1], [0], [0], [1], [0, 0, 1, 1], [], []>} : vector<8x16xf32>, vector<16x128xf32>, vector<8x128xf32> -> vector<8x128xf32>
    %51 = arith.addf %29, %50 : vector<8x128xf32>
    %52 = vector.extract_strided_slice %32 {offsets = [8, 0], sizes = [8, 128], strides = [1, 1]} : vector<48x128xf32> to vector<8x128xf32>
    %53 = arith.addf %51, %52 : vector<8x128xf32>
    %cst_45 = arith.constant 0.000000e+00 : f32
    %54 = vector.broadcast %cst_45 : f32 to vector<8x128xf32>
    %55 = arith.maximumf %53, %54 : vector<8x128xf32>
    %cst_46 = arith.constant dense<0.000000e+00> : vector<8x128xf32>
    %56 = tpu.matmul %55, %34, %cst_46 {dimension_numbers = #tpu.dot_dimension_numbers<[1], [0], [0], [1], [0, 0, 1, 1], [], []>} : vector<8x128xf32>, vector<128x128xf32>, vector<8x128xf32> -> vector<8x128xf32>
    %57 = vector.broadcast %35 : vector<1x128xf32> to vector<8x128xf32>
    %58 = arith.addf %56, %57 : vector<8x128xf32>
    %c1 = arith.constant 1 : index
    %c0_47 = arith.constant 0 : index
    %c0_48 = arith.constant 0 : index
    %59 = vector.load %arg16[%c1, %c0_47, %c0_48] : memref<6x8x128xf32, #tpu.memory_space<vmem>>, vector<1x8x128xf32>
    %60 = vector.shape_cast %59 : vector<1x8x128xf32> to vector<8x128xf32>
    %61 = vector.shape_cast %58 : vector<8x128xf32> to vector<1x8x128xf32>
    tpu.vector_store %arg16[%c1, %c0_47, %c0_48], %61 {strides = array<i32>} : memref<6x8x128xf32, #tpu.memory_space<vmem>>, vector<1x8x128xf32>,
    %62 = vector.extract_strided_slice %23 {offsets = [0, 64], sizes = [8, 16], strides = [1, 1]} : vector<8x128xf32> to vector<8x16xf32>
    %cst_49 = arith.constant dense<0.000000e+00> : vector<8x128xf32>
    %63 = tpu.matmul %62, %33, %cst_49 {dimension_numbers = #tpu.dot_dimension_numbers<[1], [0], [0], [1], [0, 0, 1, 1], [], []>} : vector<8x16xf32>, vector<16x128xf32>, vector<8x128xf32> -> vector<8x128xf32>
    %64 = arith.addf %29, %63 : vector<8x128xf32>
    %65 = vector.extract_strided_slice %32 {offsets = [16, 0], sizes = [8, 128], strides = [1, 1]} : vector<48x128xf32> to vector<8x128xf32>
    %66 = arith.addf %64, %65 : vector<8x128xf32>
    %cst_50 = arith.constant 0.000000e+00 : f32
    %67 = vector.broadcast %cst_50 : f32 to vector<8x128xf32>
    %68 = arith.maximumf %66, %67 : vector<8x128xf32>
    %cst_51 = arith.constant dense<0.000000e+00> : vector<8x128xf32>
    %69 = tpu.matmul %68, %34, %cst_51 {dimension_numbers = #tpu.dot_dimension_numbers<[1], [0], [0], [1], [0, 0, 1, 1], [], []>} : vector<8x128xf32>, vector<128x128xf32>, vector<8x128xf32> -> vector<8x128xf32>
    %70 = vector.broadcast %35 : vector<1x128xf32> to vector<8x128xf32>
    %71 = arith.addf %69, %70 : vector<8x128xf32>
    %c2 = arith.constant 2 : index
    %c0_52 = arith.constant 0 : index
    %c0_53 = arith.constant 0 : index
    %72 = vector.load %arg16[%c2, %c0_52, %c0_53] : memref<6x8x128xf32, #tpu.memory_space<vmem>>, vector<1x8x128xf32>
    %73 = vector.shape_cast %72 : vector<1x8x128xf32> to vector<8x128xf32>
    %74 = vector.shape_cast %71 : vector<8x128xf32> to vector<1x8x128xf32>
    tpu.vector_store %arg16[%c2, %c0_52, %c0_53], %74 {strides = array<i32>} : memref<6x8x128xf32, #tpu.memory_space<vmem>>, vector<1x8x128xf32>,
    %75 = vector.extract_strided_slice %23 {offsets = [0, 80], sizes = [8, 16], strides = [1, 1]} : vector<8x128xf32> to vector<8x16xf32>
    %cst_54 = arith.constant dense<0.000000e+00> : vector<8x128xf32>
    %76 = tpu.matmul %75, %33, %cst_54 {dimension_numbers = #tpu.dot_dimension_numbers<[1], [0], [0], [1], [0, 0, 1, 1], [], []>} : vector<8x16xf32>, vector<16x128xf32>, vector<8x128xf32> -> vector<8x128xf32>
    %77 = arith.addf %29, %76 : vector<8x128xf32>
    %78 = vector.extract_strided_slice %32 {offsets = [24, 0], sizes = [8, 128], strides = [1, 1]} : vector<48x128xf32> to vector<8x128xf32>
    %79 = arith.addf %77, %78 : vector<8x128xf32>
    %cst_55 = arith.constant 0.000000e+00 : f32
    %80 = vector.broadcast %cst_55 : f32 to vector<8x128xf32>
    %81 = arith.maximumf %79, %80 : vector<8x128xf32>
    %cst_56 = arith.constant dense<0.000000e+00> : vector<8x128xf32>
    %82 = tpu.matmul %81, %34, %cst_56 {dimension_numbers = #tpu.dot_dimension_numbers<[1], [0], [0], [1], [0, 0, 1, 1], [], []>} : vector<8x128xf32>, vector<128x128xf32>, vector<8x128xf32> -> vector<8x128xf32>
    %83 = vector.broadcast %35 : vector<1x128xf32> to vector<8x128xf32>
    %84 = arith.addf %82, %83 : vector<8x128xf32>
    %c3 = arith.constant 3 : index
    %c0_57 = arith.constant 0 : index
    %c0_58 = arith.constant 0 : index
    %85 = vector.load %arg16[%c3, %c0_57, %c0_58] : memref<6x8x128xf32, #tpu.memory_space<vmem>>, vector<1x8x128xf32>
    %86 = vector.shape_cast %85 : vector<1x8x128xf32> to vector<8x128xf32>
    %87 = vector.shape_cast %84 : vector<8x128xf32> to vector<1x8x128xf32>
    tpu.vector_store %arg16[%c3, %c0_57, %c0_58], %87 {strides = array<i32>} : memref<6x8x128xf32, #tpu.memory_space<vmem>>, vector<1x8x128xf32>,
    %88 = vector.extract_strided_slice %23 {offsets = [0, 96], sizes = [8, 16], strides = [1, 1]} : vector<8x128xf32> to vector<8x16xf32>
    %cst_59 = arith.constant dense<0.000000e+00> : vector<8x128xf32>
    %89 = tpu.matmul %88, %33, %cst_59 {dimension_numbers = #tpu.dot_dimension_numbers<[1], [0], [0], [1], [0, 0, 1, 1], [], []>} : vector<8x16xf32>, vector<16x128xf32>, vector<8x128xf32> -> vector<8x128xf32>
    %90 = arith.addf %29, %89 : vector<8x128xf32>
    %91 = vector.extract_strided_slice %32 {offsets = [32, 0], sizes = [8, 128], strides = [1, 1]} : vector<48x128xf32> to vector<8x128xf32>
    %92 = arith.addf %90, %91 : vector<8x128xf32>
    %cst_60 = arith.constant 0.000000e+00 : f32
    %93 = vector.broadcast %cst_60 : f32 to vector<8x128xf32>
    %94 = arith.maximumf %92, %93 : vector<8x128xf32>
    %cst_61 = arith.constant dense<0.000000e+00> : vector<8x128xf32>
    %95 = tpu.matmul %94, %34, %cst_61 {dimension_numbers = #tpu.dot_dimension_numbers<[1], [0], [0], [1], [0, 0, 1, 1], [], []>} : vector<8x128xf32>, vector<128x128xf32>, vector<8x128xf32> -> vector<8x128xf32>
    %96 = vector.broadcast %35 : vector<1x128xf32> to vector<8x128xf32>
    %97 = arith.addf %95, %96 : vector<8x128xf32>
    %c4 = arith.constant 4 : index
    %c0_62 = arith.constant 0 : index
    %c0_63 = arith.constant 0 : index
    %98 = vector.load %arg16[%c4, %c0_62, %c0_63] : memref<6x8x128xf32, #tpu.memory_space<vmem>>, vector<1x8x128xf32>
    %99 = vector.shape_cast %98 : vector<1x8x128xf32> to vector<8x128xf32>
    %100 = vector.shape_cast %97 : vector<8x128xf32> to vector<1x8x128xf32>
    tpu.vector_store %arg16[%c4, %c0_62, %c0_63], %100 {strides = array<i32>} : memref<6x8x128xf32, #tpu.memory_space<vmem>>, vector<1x8x128xf32>,
    %101 = vector.extract_strided_slice %23 {offsets = [0, 112], sizes = [8, 16], strides = [1, 1]} : vector<8x128xf32> to vector<8x16xf32>
    %cst_64 = arith.constant dense<0.000000e+00> : vector<8x128xf32>
    %102 = tpu.matmul %101, %33, %cst_64 {dimension_numbers = #tpu.dot_dimension_numbers<[1], [0], [0], [1], [0, 0, 1, 1], [], []>} : vector<8x16xf32>, vector<16x128xf32>, vector<8x128xf32> -> vector<8x128xf32>
    %103 = arith.addf %29, %102 : vector<8x128xf32>
    %104 = vector.extract_strided_slice %32 {offsets = [40, 0], sizes = [8, 128], strides = [1, 1]} : vector<48x128xf32> to vector<8x128xf32>
    %105 = arith.addf %103, %104 : vector<8x128xf32>
    %cst_65 = arith.constant 0.000000e+00 : f32
    %106 = vector.broadcast %cst_65 : f32 to vector<8x128xf32>
    %107 = arith.maximumf %105, %106 : vector<8x128xf32>
    %cst_66 = arith.constant dense<0.000000e+00> : vector<8x128xf32>
    %108 = tpu.matmul %107, %34, %cst_66 {dimension_numbers = #tpu.dot_dimension_numbers<[1], [0], [0], [1], [0, 0, 1, 1], [], []>} : vector<8x128xf32>, vector<128x128xf32>, vector<8x128xf32> -> vector<8x128xf32>
    %109 = vector.broadcast %35 : vector<1x128xf32> to vector<8x128xf32>
    %110 = arith.addf %108, %109 : vector<8x128xf32>
    %c5 = arith.constant 5 : index
    %c0_67 = arith.constant 0 : index
    %c0_68 = arith.constant 0 : index
    %111 = vector.load %arg16[%c5, %c0_67, %c0_68] : memref<6x8x128xf32, #tpu.memory_space<vmem>>, vector<1x8x128xf32>
    %112 = vector.shape_cast %111 : vector<1x8x128xf32> to vector<8x128xf32>
    %113 = vector.shape_cast %110 : vector<8x128xf32> to vector<1x8x128xf32>
    tpu.vector_store %arg16[%c5, %c0_67, %c0_68], %113 {strides = array<i32>} : memref<6x8x128xf32, #tpu.memory_space<vmem>>, vector<1x8x128xf32>,
    return
  }
}

</mosaic_0001>

<bundles_post_ra>
// kernel: decoder_net_forward.1
= control target key start
LH: loop header
LB: loop body
LE: loop exit
PB: predicated region body
PF: predicated region fallthrough
CT: control target
= control target key end

     0   :  { %s3111_s0 = inlined_call_operand.hbm [shape: f32[8,16], index: 0, kind: input, shape index: {}]   ;;  %s3112_s1 = inlined_call_operand.vmem [shape: f32[8,24], index: 1, kind: input, shape index: {}]   ;;  %s3113_s2 = inlined_call_operand.vmem [shape: f32[48,8], index: 2, kind: input, shape index: {}]   ;;  %s3114_s3 = inlined_call_operand.hbm [shape: f32[16,128], index: 3, kind: input, shape index: {}]   ;;  %s3115_s4 = inlined_call_operand.hbm [shape: f32[24,128], index: 4, kind: input, shape index: {}]   ;;  %s3116_s5 = inlined_call_operand.vmem [shape: f32[1,128], index: 5, kind: input, shape index: {}]   ;;  %s3117_s6 = inlined_call_operand.vmem [shape: f32[128,128], index: 6, kind: input, shape index: {}]   ;;  %s3118_s7 = inlined_call_operand.hbm [shape: f32[1,128], index: 7, kind: input, shape index: {}]   ;;  %s3119_s8 = inlined_call_operand.vmem [shape: f32[128,128], index: 8, kind: input, shape index: {}]   ;;  %s3120_s9 = inlined_call_operand.hbm [shape: f32[1,128], index: 9, kind: input, shape index: {}]   ;;  %s3121_s10 = inlined_call_operand.vmem [shape: f32[32,128], index: 10, kind: input, shape index: {}]   ;;  %s3122_s11 = inlined_call_operand.hbm [shape: f32[16,128], index: 11, kind: input, shape index: {}]   ;;  %s3123_s12 = inlined_call_operand.hbm [shape: f32[8,128], index: 12, kind: input, shape index: {}]   ;;  %s3124_s13 = inlined_call_operand.hbm [shape: f32[1,128], index: 13, kind: input, shape index: {}]   ;;  %s3125_s14 = inlined_call_operand.hbm [shape: f32[128,128], index: 14, kind: input, shape index: {}]   ;;  %s3126_s15 = inlined_call_operand.hbm [shape: f32[1,128], index: 15, kind: input, shape index: {}]   ;;  %s3127_s16 = inlined_call_operand.vmem [shape: f32[6,8,128], index: 16, kind: output, shape index: {}]  }
   0x1   :  { %3128 = sst [smem:[#allocation24_spill]] %s3111_s0 }
   0x2   :  { %21 = vsyncpa [#allocation3], 0 }
   0x3   :  { %22 = vsyncpa [#allocation5], 0 }
   0x4   :  { %23 = vsyncpa [#allocation8], 0 }
   0x5   :  { %24 = vsyncpa [#allocation11], 0 }
   0x6   :  { %25 = vsyncpa [#allocation14], 0 }
   0x7   :  { %26 = vsyncpa [#allocation17], 0  ;;  %s2452_s21 = smov [#allocation4]  }
   0x8   :  { %s46_s22 = sshll.u32 %s2452_s21, 4  ;;  %s47_s22 = int_to_ptr.vmem [resolvable:$true] %s46_s22 }
   0x9   :  { %s2248_s23 = scalar_lea.vmem %s47_s22, 256  ;;  %p2253_p1 = scmp.lt.s32.totalorder %s47_s22, %s47_s22 }
   0xa   :  { %p2249_p0 = scmp.ne.s32.totalorder %s47_s22, %s2248_s23  ;;  %p2254_p2 = scmp.lt.s32.totalorder %s2248_s23, %s2248_s23 }
   0xc   :  { %p2255_p3 = por %p2254_p2, %p2253_p1 }
   0xe   :  { %p2256_p4 = pnand %p2255_p3, %p2249_p0 }
  0x10   :  { %2259 = shalt.err (!%p2256_p4)
}
  0x11   :  { %s2453_s24 = smov 128   ;;  %s2454_s25 = smov 8  }
  0x12   :  { %52 = dma.hbm_to_vmem [thread:$0]  %s3114_s3, 256, %s47_s22, [#allocation5], %s2453_s24, %s2453_s24, %s2454_s25  }
  0x13   :  { %s2455_s28 = smov [#allocation7]   ;;  %s2456_s30 = smov [#allocation10]  }
  0x14   :  { %s75_s29 = sshll.u32 %s2455_s28, 4  ;;  %s98_s0 = sshll.u32 %s2456_s30, 4  ;;  %s76_s29 = int_to_ptr.vmem [resolvable:$true] %s75_s29  ;;  %s99_s0 = int_to_ptr.vmem [resolvable:$true] %s98_s0 }
  0x15   :  { %s2268_s17 = scalar_lea.vmem %s76_s29, 16  ;;  %s2272_s18 = scalar_lea.vmem %s76_s29, 32 }
  0x16   :  { %p2269_p5 = scmp.ne.s32.totalorder %s76_s29, %s2268_s17  ;;  %p2273_p6 = scmp.lt.s32.totalorder %s76_s29, %s76_s29 }
  0x17   :  { %p2274_p7 = scmp.lt.s32.totalorder %s2272_s18, %s2268_s17 }
  0x19   :  { %p2275_p8 = por %p2274_p7, %p2273_p6 }
  0x1b   :  { %p2276_p9 = pnand %p2275_p8, %p2269_p5 }
  0x1d   :  { %2279 = shalt.err (!%p2276_p9)
}
  0x1e   :  { %78 = dma.hbm_to_vmem [thread:$0]  %s3118_s7, 16, %s76_s29, [#allocation8]  }
  0x1f   :  { %s2288_s21 = scalar_lea.vmem %s99_s0, 256  ;;  %p2293_p11 = scmp.lt.s32.totalorder %s99_s0, %s99_s0 }
  0x20   :  { %p2289_p10 = scmp.ne.s32.totalorder %s99_s0, %s2288_s21  ;;  %p2294_p12 = scmp.lt.s32.totalorder %s2288_s21, %s2288_s21 }
  0x22   :  { %p2295_p13 = por %p2294_p12, %p2293_p11 }
  0x24   :  { %p2296_p0 = pnand %p2295_p13, %p2289_p10 }
  0x26   :  { %2299 = shalt.err (!%p2296_p0)
}
  0x27   :  { %104 = dma.hbm_to_vmem [thread:$0]  %s3122_s11, 256, %s99_s0, [#allocation11], %s2453_s24, %s2453_s24, %s2454_s25  }
  0x28   :  { %s2457_s23 = smov [#allocation13]   ;;  %s2458_s27 = smov [#allocation2]  }
  0x29   :  { %s121_s26 = sshll.u32 %s2457_s23, 4  ;;  %s33_s7 = sshll.u32 %s2458_s27, 4  ;;  %s122_s26 = int_to_ptr.vmem [resolvable:$true] %s121_s26  ;;  %s34_s7 = int_to_ptr.vmem [resolvable:$true] %s33_s7 }
  0x2a   :  { %s2308_s28 = scalar_lea.vmem %s122_s26, 16  ;;  %s2312_s29 = scalar_lea.vmem %s122_s26, 32 }
  0x2b   :  { %p2309_p1 = scmp.ne.s32.totalorder %s122_s26, %s2308_s28  ;;  %p2313_p2 = scmp.lt.s32.totalorder %s122_s26, %s122_s26 }
  0x2c   :  { %p2314_p3 = scmp.lt.s32.totalorder %s2312_s29, %s2308_s28 }
  0x2e   :  { %p2315_p4 = por %p2314_p3, %p2313_p2 }
  0x30   :  { %p2316_p5 = pnand %p2315_p4, %p2309_p1 }
  0x32   :  { %2319 = shalt.err (!%p2316_p5)
}
  0x33   :  { %124 = dma.hbm_to_vmem [thread:$0]  %s3124_s13, 16, %s122_s26, [#allocation14]  }
  0x34   :  { %s2328_s18 = scalar_lea.vmem %s34_s7, 128  ;;  %p2333_p7 = scmp.lt.s32.totalorder %s34_s7, %s34_s7 }
  0x35   :  { %p2329_p6 = scmp.ne.s32.totalorder %s34_s7, %s2328_s18  ;;  %p2334_p8 = scmp.lt.s32.totalorder %s2328_s18, %s2328_s18 }
  0x37   :  { %p2335_p9 = por %p2334_p8, %p2333_p7 }
  0x39   :  { %p2336_p10 = pnand %p2335_p9, %p2329_p6 }
  0x3b   :  { %2339 = shalt.err (!%p2336_p10)
}
  0x3c   :  { %s3129_s19 = sld [smem:[#allocation24_spill]]  ;;  %s2459_s20 = smov [#allocation6]  }
  0x3d   :  { %s58_s21 = sshll.u32 %s2459_s20, 4  ;;  %s2460_s3 = smov [#allocation9]   ;;  %s59_s21 = int_to_ptr.vmem [resolvable:$true] %s58_s21 }
  0x3e   :  { %s87_s22 = sshll.u32 %s2460_s3, 4  ;;  %s2348_s23 = scalar_lea.vmem %s59_s21, 384  ;;  %s88_s22 = int_to_ptr.vmem [resolvable:$true] %s87_s22 }
  0x3f   :  { %p2349_p11 = scmp.ne.s32.totalorder %s59_s21, %s2348_s23  ;;  %p2353_p12 = scmp.lt.s32.totalorder %s59_s21, %s59_s21 }
  0x40   :  { %p2354_p13 = scmp.lt.s32.totalorder %s2348_s23, %s2348_s23 }
  0x42   :  { %36 = dma.hbm_to_vmem [thread:$0]  %s3129_s19, 128, %s34_s7, [#allocation3]  }
  0x43   :  { %p2355_p0 = por %p2354_p13, %p2353_p12 }
  0x45   :  { %p2356_p1 = pnand %p2355_p0, %p2349_p11 }
  0x47   :  { %2359 = shalt.err (!%p2356_p1)
}
  0x48   :  { %64 = dma.hbm_to_vmem [thread:$0]  %s3115_s4, 384, %s59_s21, [#allocation5], %s2453_s24, %s2453_s24, %s2454_s25  }
  0x49   :  { %s2368_s27 = scalar_lea.vmem %s88_s22, 16  ;;  %s2372_s7 = scalar_lea.vmem %s88_s22, 32 }
  0x4a   :  { %p2369_p2 = scmp.ne.s32.totalorder %s88_s22, %s2368_s27  ;;  %p2373_p3 = scmp.lt.s32.totalorder %s88_s22, %s88_s22 }
  0x4b   :  { %p2374_p4 = scmp.lt.s32.totalorder %s2372_s7, %s2368_s27 }
  0x4d   :  { %p2375_p5 = por %p2374_p4, %p2373_p3 }
  0x4f   :  { %p2376_p6 = pnand %p2375_p5, %p2369_p2 }
  0x51   :  { %2379 = shalt.err (!%p2376_p6)
}
  0x52   :  { %90 = dma.hbm_to_vmem [thread:$0]  %s3120_s9, 16, %s88_s22, [#allocation8]  }
  0x53   :  { %s2461_s30 = smov [#allocation12]   ;;  %s2462_s18 = smov [#allocation15]  }
  0x54   :  { %s111_s17 = sshll.u32 %s2461_s30, 4  ;;  %s130_s11 = sshll.u32 %s2462_s18, 4  ;;  %s112_s17 = int_to_ptr.vmem [resolvable:$true] %s111_s17  ;;  %s131_s11 = int_to_ptr.vmem [resolvable:$true] %s130_s11 }
  0x55   :  { %s2388_s0 = scalar_lea.vmem %s112_s17, 128  ;;  %p2393_p8 = scmp.lt.s32.totalorder %s112_s17, %s112_s17 }
  0x56   :  { %p2389_p7 = scmp.ne.s32.totalorder %s112_s17, %s2388_s0  ;;  %p2394_p9 = scmp.lt.s32.totalorder %s2388_s0, %s2388_s0 }
  0x58   :  { %p2395_p10 = por %p2394_p9, %p2393_p8 }
  0x5a   :  { %p2396_p11 = pnand %p2395_p10, %p2389_p7 }
  0x5c   :  { %2399 = shalt.err (!%p2396_p11)
}
  0x5d   :  { %114 = dma.hbm_to_vmem [thread:$0]  %s3123_s12, 128, %s112_s17, [#allocation11]  }
  0x5e   :  { %s2408_s20 = scalar_lea.vmem %s131_s11, 2048  ;;  %p2413_p13 = scmp.lt.s32.totalorder %s131_s11, %s131_s11 }
  0x5f   :  { %p2409_p12 = scmp.ne.s32.totalorder %s131_s11, %s2408_s20  ;;  %p2414_p0 = scmp.lt.s32.totalorder %s2408_s20, %s2408_s20 }
  0x61   :  { %p2415_p1 = por %p2414_p0, %p2413_p13 }
  0x63   :  { %p2416_p2 = pnand %p2415_p1, %p2409_p12 }
  0x65   :  { %2419 = shalt.err (!%p2416_p2)
}
  0x66   :  { %136 = dma.hbm_to_vmem [thread:$0]  %s3125_s14, 2048, %s131_s11, [#allocation14], %s2453_s24, %s2453_s24, %s2454_s25  }
  0x67   :  { %s2463_s3 = smov [#allocation16]  }
  0x68   :  { %s143_s22 = sshll.u32 %s2463_s3, 4  ;;  %s144_s22 = int_to_ptr.vmem [resolvable:$true] %s143_s22 }
  0x69   :  { %s2428_s23 = scalar_lea.vmem %s144_s22, 16  ;;  %s2432_s12 = scalar_lea.vmem %s144_s22, 32 }
  0x6a   :  { %p2429_p3 = scmp.ne.s32.totalorder %s144_s22, %s2428_s23  ;;  %p2433_p4 = scmp.lt.s32.totalorder %s144_s22, %s144_s22 }
  0x6b   :  { %p2434_p5 = scmp.lt.s32.totalorder %s2432_s12, %s2428_s23 }
  0x6d   :  { %p2435_p6 = por %p2434_p5, %p2433_p4 }
  0x6f   :  { %p2436_p7 = pnand %p2435_p6, %p2429_p3 }
  0x71   :  { %2439 = shalt.err (!%p2436_p7)
}
  0x72   :  { %146 = dma.hbm_to_vmem [thread:$0]  %s3126_s15, 16, %s144_s22, [#allocation17]  }
  0x73   :  { %2440 = dma.done.wait [#allocation3], 128  }
  0x74   :  { %2441 = vsyncadd [#allocation3], 4294967168 }
  0x75   :  { %2442 = dma.done.wait [#allocation5], 640  }
  0x76   :  { %2443 = vsyncadd [#allocation5], 4294966656 }
  0x77   :  { %2444 = dma.done.wait [#allocation8], 32  }
  0x78   :  { %2445 = vsyncadd [#allocation8], 4294967264 }
  0x79   :  { %2446 = dma.done.wait [#allocation11], 384  }
  0x7a   :  { %2447 = vsyncadd [#allocation11], 4294966912 }
  0x7b   :  { %2448 = dma.done.wait [#allocation14], 2064  }
  0x7c   :  { %2449 = vsyncadd [#allocation14], 4294965232 }
  0x7d   :  { %2450 = dma.done.wait [#allocation17], 16  }
  0x7e   :  { %2451 = vsyncadd [#allocation17], 4294967280  ;;  %v2464_v0 = vmov 0.0   ;;  %vm2465_vm0 = vmmov 0   ;;  %v183_v1 = vld [vmem:[#allocation6 + $0x10] sm:$0xff]  ;;  %v182_v2 = vld [vmem:[#allocation6 + $0x8] sm:$0xff] }
  0x7f   :  { %1860 = vmatprep.subr.mxu0 %v2464_v0  ;;  %1866 = vmatprep.mubr.msk.f32.mxu0 %vm2465_vm0, %v2464_v0  ;;  %v181_v3 = vld [vmem:[#allocation6] sm:$0xff]  ;;  %v355_v5 = vld [vmem:[%s3117_s6 + $0x70] sm:$0xff]  ;;  %v180_v6 = vld [vmem:[%s3112_s1] sm:$0xff]  ;;  %vm184_vm1 = vcmask 195584   ;;  %vm258_vm2 = vcmask 130048   ;;  %vm620_vm3 = vcmask 64512  }
  0x80   :  { %1876 = vmatprep.subr.mxu1 %v2464_v0  ;;  %1908 = vmatprep.mubr.msk.f32.mxu1 %vm2465_vm0, %v2464_v0  ;;  %v356_v4 = vld [vmem:[%s3117_s6 + $0x78] sm:$0xff]  ;;  %v179_v7 = vld [vmem:[#allocation4 + $0x8] sm:$0xff]  ;;  %v178_v8 = vld [vmem:[#allocation4] sm:$0xff]  ;;  %vm539_vm4 = vcmask 261120   ;;  %s2467_s15 = smov 96   ;;  %s2468_s24 = smov 48  }
  0x81   :  { %1861 = vmatpush3.msra.mxu0 %v183_v1  ;;  %1877 = vmatpush3.msra.mxu1 %v356_v4  ;;  %v354_v9 = vld [vmem:[%s3117_s6 + $0x68] sm:$0xff]  ;;  %v177_v10 = vld [vmem:[#allocation2] sm:$0xff]  ;;  %v352_v12 = vld [vmem:[%s3117_s6 + $0x58] sm:$0xff]  ;;  %s2469_s25 = smov 80   ;;  %s2470_s27 = smov 16  }
  0x82   :  { %1862 = vmatprep.subr.mxu0 %v2464_v0  ;;  %1878 = vmatprep.subr.mxu1 %v2464_v0  ;;  %v353_v11 = vld [vmem:[%s3117_s6 + $0x60] sm:$0xff]  ;;  %v351_v13 = vld [vmem:[%s3117_s6 + $0x50] sm:$0xff]  ;;  %v350_v14 = vld [vmem:[%s3117_s6 + $0x48] sm:$0xff]  ;;  %s2471_s7 = smov 32  }
  0x83   :  { %1863 = vmatpush3.msra.mxu0 %v182_v2  ;;  %1879 = vmatpush3.msra.mxu1 %v355_v5  ;;  %v349_v15 = vld [vmem:[%s3117_s6 + $0x40] sm:$0xff]  ;;  %v348_v16 = vld [vmem:[%s3117_s6 + $0x38] sm:$0xff]  ;;  %v347_v17 = vld [vmem:[%s3117_s6 + $0x30] sm:$0xff] }
  0x84   :  { %1864 = vmatprep.subr.mxu0 %v2464_v0  ;;  %1880 = vmatprep.subr.mxu1 %v2464_v0  ;;  %v346_v18 = vld [vmem:[%s3117_s6 + $0x28] sm:$0xff]  ;;  %v345_v19 = vld [vmem:[%s3117_s6 + $0x20] sm:$0xff]  ;;  %v344_v20 = vld [vmem:[%s3117_s6 + $0x18] sm:$0xff] }
  0x85   :  { %1865 = vmatpush3.msra.mxu0 %v181_v3  ;;  %1881 = vmatpush3.msra.mxu1 %v354_v9  ;;  %v343_v21 = vld [vmem:[%s3117_s6 + $0x10] sm:$0xff]  ;;  %v342_v22 = vld [vmem:[%s3117_s6 + $0x8] sm:$0xff]  ;;  %v341_v23 = vld [vmem:[%s3117_s6] sm:$0xff] }
  0x86   :  { %1867 = vmatmul.mubr.msk.f32.vlgmr.msra.gmra.mxu0 %vm184_vm1, %v180_v6  ;;  %1869 = vmatprep.subr.mxu0 %v2464_v0  ;;  %v450_v24 = vld [vmem:[%s3119_s8 + $0x78] sm:$0xff]  ;;  %v449_v25 = vld [vmem:[%s3119_s8 + $0x70] sm:$0xff]  ;;  %v448_v26 = vld [vmem:[%s3119_s8 + $0x68] sm:$0xff] }
  0x87   :  { %1870 = vmatpush3.msra.mxu0 %v179_v7  ;;  %1873 = vmatprep.mubr.msk.f32.mxu0 %vm2465_vm0, %v2464_v0  ;;  %v447_v27 = vld [vmem:[%s3119_s8 + $0x60] sm:$0xff]  ;;  %v446_v28 = vld [vmem:[%s3119_s8 + $0x58] sm:$0xff]  ;;  %v445_v29 = vld [vmem:[%s3119_s8 + $0x50] sm:$0xff] }
  0x88   :  { %1871 = vmatprep.subr.mxu0 %v2464_v0  ;;  %1882 = vmatprep.subr.mxu1 %v2464_v0  ;;  %v444_v30 = vld [vmem:[%s3119_s8 + $0x48] sm:$0xff]  ;;  %v443_v31 = vld [vmem:[%s3119_s8 + $0x40] sm:$0xff]  ;;  %v442_v32 = vld [vmem:[%s3119_s8 + $0x38] sm:$0xff] }
  0x89   :  { %1872 = vmatpush3.msra.mxu0 %v178_v8  ;;  %1883 = vmatpush3.msra.mxu1 %v353_v11  ;;  %v441_v33 = vld [vmem:[%s3119_s8 + $0x30] sm:$0xff]  ;;  %v440_v34 = vld [vmem:[%s3119_s8 + $0x28] sm:$0xff]  ;;  %v439_v35 = vld [vmem:[%s3119_s8 + $0x20] sm:$0xff] }
  0x8a   :  { %1874 = vmatmul.mubr.msk.f32.vlgmr.msra.gmra.mxu0 %vm258_vm2, %v177_v10  ;;  %1911 = vmatprep.subr.mxu0 %v2464_v0  ;;  %v438_v36 = vld [vmem:[%s3119_s8 + $0x18] sm:$0xff]  ;;  %v1664_v40 = vld [vmem:[%s3116_s5] ss:$0 sm:$0xff]  ;;  %v437_v45 = vld [vmem:[%s3119_s8 + $0x10] sm:$0xff] }
  0x8b   :  { %1884 = vmatprep.subr.mxu1 %v2464_v0  ;;  %1943 = vmatprep.mubr.msk.f32.mxu0 %vm2465_vm0, %v2464_v0  ;;  %v436_v46 = vld [vmem:[%s3119_s8 + $0x8] sm:$0xff]  ;;  %v435_v47 = vld [vmem:[%s3119_s8] sm:$0xff]  ;;  %v531_v48 = vld [vmem:[%s3121_s10 + $0x18] sm:$0xff] }
  0x8c   :  { %1885 = vmatpush3.msra.mxu1 %v352_v12  ;;  %1912 = vmatpush3.msra.mxu0 %v450_v24  ;;  %v530_v49 = vld [vmem:[%s3121_s10 + $0x10] sm:$0xff]  ;;  %v529_v55 = vld [vmem:[%s3121_s10 + $0x8] sm:$0xff]  ;;  %v528_v56 = vld [vmem:[%s3121_s10] sm:$0xff]  ;;  %s2466_s10 = smov 64  }
  0x8d   :  { %1886 = vmatprep.subr.mxu1 %v2464_v0  ;;  %1913 = vmatprep.subr.mxu0 %v2464_v0  ;;  %v1665_v50 = vld [vmem:[#allocation7] ss:$0 sm:$0xff]  ;;  %v619_v57 = vld [vmem:[#allocation12] sm:$0xff]  ;;  %v1666_v60 = vld [vmem:[#allocation9] ss:$0 sm:$0xff] }
  0x8e   :  { %1887 = vmatpush3.msra.mxu1 %v351_v13  ;;  %1914 = vmatpush3.msra.mxu0 %v449_v25  ;;  %v613_v58 = vld [vmem:[%s3113_s2] sm:$0xff]  ;;  %v614_v59 = vld [vmem:[%s3113_s2 + $0x8] sm:$0xff]  ;;  %v2778_v2 = vld [vmem:[#allocation10] sm:$0xff] }
  0x8f   :  { %1888 = vmatprep.subr.mxu1 %v2464_v0  ;;  %1915 = vmatprep.subr.mxu0 %v2464_v0  ;;  %v2775_v1 = vld [vmem:[#allocation10 + $0x8] sm:$0xff]  ;;  %v2785_v3 = vld [vmem:[#allocation15 + $0x78] sm:$0xff]  ;;  %v615_v6 = vld [vmem:[%s3113_s2 + $0x10] sm:$0xff] }
  0x90   :  { %1889 = vmatpush3.msra.mxu1 %v350_v14  ;;  %1916 = vmatpush3.msra.mxu0 %v448_v26  ;;  %v2787_v4 = vld [vmem:[#allocation15 + $0x70] sm:$0xff]  ;;  %v2791_v5 = vld [vmem:[#allocation15 + $0x68] sm:$0xff]  ;;  %v2798_v7 = vld [vmem:[#allocation15 + $0x60] sm:$0xff] }
  0x91   :  { %1890 = vmatprep.subr.mxu1 %v2464_v0  ;;  %1917 = vmatprep.subr.mxu0 %v2464_v0  ;;  %v616_v8 = vld [vmem:[%s3113_s2 + $0x18] sm:$0xff]  ;;  %v2806_v9 = vld [vmem:[#allocation15 + $0x58] sm:$0xff]  ;;  %v2819_v12 = vld [vmem:[#allocation15 + $0x40] sm:$0xff] }
  0x92   :  { %1891 = vmatpush3.msra.mxu1 %v349_v15  ;;  %1918 = vmatpush3.msra.mxu0 %v447_v27  ;;  %v2811_v10 = vld [vmem:[#allocation15 + $0x50] sm:$0xff]  ;;  %v2815_v11 = vld [vmem:[#allocation15 + $0x48] sm:$0xff]  ;;  %v2823_v13 = vld [vmem:[#allocation15 + $0x38] sm:$0xff] }
  0x93   :  { %1892 = vmatprep.subr.mxu1 %v2464_v0  ;;  %1919 = vmatprep.subr.mxu0 %v2464_v0  ;;  %v2827_v14 = vld [vmem:[#allocation15 + $0x30] sm:$0xff]  ;;  %v2831_v15 = vld [vmem:[#allocation15 + $0x28] sm:$0xff]  ;;  %v2899_v24 = vld [vmem:[#allocation15] sm:$0xff] }
  0x94   :  { %1893 = vmatpush3.msra.mxu1 %v348_v16  ;;  %1920 = vmatpush3.msra.mxu0 %v446_v28  ;;  %v2835_v16 = vld [vmem:[#allocation15 + $0x20] sm:$0xff]  ;;  %v1667_v27 = vld [vmem:[#allocation13] ss:$0 sm:$0xff] }
  0x95   :  { %1894 = vmatprep.subr.mxu1 %v2464_v0  ;;  %1921 = vmatprep.subr.mxu0 %v2464_v0 }
  0x96   :  { %1895 = vmatpush3.msra.mxu1 %v347_v17  ;;  %1922 = vmatpush3.msra.mxu0 %v445_v29 }
  0x97   :  { %1896 = vmatprep.subr.mxu1 %v2464_v0  ;;  %1923 = vmatprep.subr.mxu0 %v2464_v0 }
  0x98   :  { %1897 = vmatpush3.msra.mxu1 %v346_v18  ;;  %1924 = vmatpush3.msra.mxu0 %v444_v30 }
  0x99   :  { %1898 = vmatprep.subr.mxu1 %v2464_v0  ;;  %1925 = vmatprep.subr.mxu0 %v2464_v0 }
  0x9a   :  { %1899 = vmatpush3.msra.mxu1 %v345_v19  ;;  %1926 = vmatpush3.msra.mxu0 %v443_v31  ;;  %v2875_v19 = vld [vmem:[#allocation15 + $0x18] sm:$0xff] }
  0x9b   :  { %1900 = vmatprep.subr.mxu1 %v2464_v0  ;;  %1927 = vmatprep.subr.mxu0 %v2464_v0 }
  0x9c   :  { %1901 = vmatpush3.msra.mxu1 %v344_v20  ;;  %1928 = vmatpush3.msra.mxu0 %v442_v32  ;;  %v617_v20 = vld [vmem:[%s3113_s2 + $0x20] sm:$0xff] }
  0x9d   :  { %1902 = vmatprep.subr.mxu1 %v2464_v0  ;;  %1929 = vmatprep.subr.mxu0 %v2464_v0 }
  0x9e   :  { %1903 = vmatpush3.msra.mxu1 %v343_v21  ;;  %1930 = vmatpush3.msra.mxu0 %v441_v33  ;;  %v2883_v21 = vld [vmem:[#allocation15 + $0x10] sm:$0xff] }
  0x9f   :  { %1904 = vmatprep.subr.mxu1 %v2464_v0  ;;  %1931 = vmatprep.subr.mxu0 %v2464_v0 }
  0xa0   :  { %1905 = vmatpush3.msra.mxu1 %v342_v22  ;;  %1932 = vmatpush3.msra.mxu0 %v440_v34  ;;  %v618_v22 = vld [vmem:[%s3113_s2 + $0x28] sm:$0xff] }
  0xa1   :  { %1906 = vmatprep.subr.mxu1 %v2464_v0  ;;  %1933 = vmatprep.subr.mxu0 %v2464_v0 }
  0xa2   :  { %1907 = vmatpush3.msra.mxu1 %v341_v23  ;;  %1934 = vmatpush3.msra.mxu0 %v439_v35  ;;  %v2893_v23 = vld [vmem:[#allocation15 + $0x8] sm:$0xff] }
  0xa3   :  { %1946 = vmatprep.subr.mxu1 %v2464_v0  ;;  %1935 = vmatprep.subr.mxu0 %v2464_v0 }
  0xa4   :  { %1936 = vmatpush3.msra.mxu0 %v438_v36 }
  0xa5   :  { %1937 = vmatprep.subr.mxu0 %v2464_v0 }
  0xa6   :  { %1938 = vmatpush3.msra.mxu0 %v437_v45 }
  0xa7   :  { %1939 = vmatprep.subr.mxu0 %v2464_v0 }
  0xa8   :  { %1940 = vmatpush3.msra.mxu0 %v436_v46 }
  0xa9   :  { %1941 = vmatprep.subr.mxu0 %v2464_v0 }
  0xaa   :  { %1942 = vmatpush3.msra.mxu0 %v435_v47  ;;  %v2999_v47 = vld [vmem:[#allocation16] ss:$0 sm:$0xff] }
  0xab   :  { %1957 = vmatprep.subr.mxu0 %v619_v57 }
 0x146   :  { %v254_v37 = vpop.f32.mrf.mxu0 }
 0x148   :  { %v1868_v38 = vpop.f32.mrf.mxu0 }
 0x14a   :  { %v328_v39 = vpop.f32.mrf.mxu0 }
 0x14b   :  { %v329_v41 = vadd.f32 %v328_v39, %v254_v37 }
 0x14c   :  { %v1875_v42 = vpop.f32.mrf.mxu0 }
 0x14d   :  { %v339_v43 = vadd.f32 %v1664_v40, %v329_v41 }
 0x14f   :  { %v340_v44 = vmax.f32 %v339_v43, 0.0 }
 0x151   :  { %1909 = vmatmul.mubr.f32.vlgmr.msra.gmra.mxu1 %v340_v44 }
 0x152   :  { %1954 = vmatprep.mubr.msk.f32.mxu1 %vm2465_vm0, %v2464_v0  ;;  %1947 = vmatpush3.msra.mxu1 %v531_v48 }
 0x153   :  { %1948 = vmatprep.subr.mxu1 %v2464_v0 }
 0x154   :  { %1949 = vmatpush3.msra.mxu1 %v530_v49 }
 0x155   :  { %1950 = vmatprep.subr.mxu1 %v2464_v0 }
 0x156   :  { %1951 = vmatpush3.msra.mxu1 %v529_v55 }
 0x157   :  { %1952 = vmatprep.subr.mxu1 %v2464_v0 }
 0x158   :  { %1953 = vmatpush3.msra.mxu1 %v528_v56 }
 0x159   :  { %1968 = vmatprep.subr.mxu1 %v2464_v0 }
 0x211   :  { %v430_v51 = vpop.f32.mrf.mxu1 }
 0x212   :  { %v431_v52 = vadd.f32 %v1665_v50, %v430_v51 }
 0x213   :  { %v1910_v53 = vpop.f32.mrf.mxu1 }
 0x214   :  { %v434_v54 = vmax.f32 %v431_v52, 0.0 }
 0x216   :  { %1944 = vmatmul.mubr.f32.vlgmr.msra.gmra.mxu0 %v434_v54 }
 0x217   :  { %1959 = vmatprep.mubr.msk.f32.mxu0 %vm620_vm3, %v613_v58  ;;  %1958 = vmatpush3.msra.mxu0 %v619_v57 }
 0x218   :  { %1975 = vmatprep.subr.mxu0 %v2464_v0 }
 0x21a   :  { %1960 = vmatmul.mubr.msk.f32.vlgmr.msra.gmra.mxu0 %vm620_vm3, %v614_v59 }
 0x21b   :  { %1976 = vmatpush3.msra.mxu0 %v2785_v3  ;;  %1962 = vmatprep.mubr.msk.f32.mxu0 %vm620_vm3, %v615_v6 }
 0x21c   :  { %1977 = vmatprep.subr.mxu0 %v2464_v0 }
 0x21d   :  { %1978 = vmatpush3.msra.mxu0 %v2787_v4 }
 0x21e   :  { %1979 = vmatprep.subr.mxu0 %v2464_v0  ;;  %1963 = vmatmul.mubr.msk.f32.gmra.mxu0 %vm620_vm3, %v616_v8 }
 0x21f   :  { %1980 = vmatpush3.msra.mxu0 %v2791_v5  ;;  %1965 = vmatprep.mubr.msk.f32.mxu0 %vm620_vm3, %v617_v20 }
 0x220   :  { %1981 = vmatprep.subr.mxu0 %v2464_v0 }
 0x221   :  { %1982 = vmatpush3.msra.mxu0 %v2798_v7 }
 0x222   :  { %1983 = vmatprep.subr.mxu0 %v2464_v0  ;;  %1966 = vmatmul.mubr.msk.f32.gmra.mxu0 %vm620_vm3, %v618_v22 }
 0x223   :  { %1984 = vmatpush3.msra.mxu0 %v2806_v9  ;;  %2007 = vmatprep.mubr.msk.f32.mxu0 %vm2465_vm0, %v2464_v0 }
 0x224   :  { %1985 = vmatprep.subr.mxu0 %v2464_v0 }
 0x225   :  { %1986 = vmatpush3.msra.mxu0 %v2811_v10 }
 0x226   :  { %1987 = vmatprep.subr.mxu0 %v2464_v0 }
 0x227   :  { %1988 = vmatpush3.msra.mxu0 %v2815_v11 }
 0x228   :  { %1989 = vmatprep.subr.mxu0 %v2464_v0 }
 0x229   :  { %1990 = vmatpush3.msra.mxu0 %v2819_v12 }
 0x22a   :  { %1991 = vmatprep.subr.mxu0 %v2464_v0 }
 0x22b   :  { %1992 = vmatpush3.msra.mxu0 %v2823_v13 }
 0x22c   :  { %1993 = vmatprep.subr.mxu0 %v2464_v0 }
 0x22d   :  { %1994 = vmatpush3.msra.mxu0 %v2827_v14 }
 0x22e   :  { %1995 = vmatprep.subr.mxu0 %v2464_v0 }
 0x22f   :  { %1996 = vmatpush3.msra.mxu0 %v2831_v15 }
 0x230   :  { %1997 = vmatprep.subr.mxu0 %v2464_v0 }
 0x231   :  { %1998 = vmatpush3.msra.mxu0 %v2835_v16 }
 0x232   :  { %1999 = vmatprep.subr.mxu0 %v2464_v0 }
 0x233   :  { %2000 = vmatpush3.msra.mxu0 %v2875_v19 }
 0x234   :  { %2001 = vmatprep.subr.mxu0 %v2464_v0 }
 0x235   :  { %2002 = vmatpush3.msra.mxu0 %v2883_v21 }
 0x236   :  { %2003 = vmatprep.subr.mxu0 %v2464_v0 }
 0x237   :  { %2004 = vmatpush3.msra.mxu0 %v2893_v23 }
 0x238   :  { %2005 = vmatprep.subr.mxu0 %v2464_v0 }
 0x239   :  { %2006 = vmatpush3.msra.mxu0 %v2899_v24 }
 0x23a   :  { %2052 = vmatprep.subr.mxu0 %v2464_v0 }
 0x2d6   :  { %v524_v61 = vpop.f32.mrf.mxu0 }
 0x2d7   :  { %v525_v62 = vadd.f32 %v1666_v60, %v524_v61 }
 0x2d8   :  { %v1945_v63 = vpop.f32.mrf.mxu0 }
 0x2d9   :  { %1056 = vrot.lane.b32.xlu1 %v525_v62, %s2466_s10  ;;  %753 = vrot.lane.b32.xlu0 %v525_v62, %s2467_s15 }
 0x2da   :  { %1955 = vmatmul.mubr.msk.f32.vlgmr.msra.gmra.mxu1 %vm539_vm4, %v525_v62  ;;  %v1961_v28 = vpop.f32.mrf.mxu0 }
 0x2db   :  { %1969 = vmatpush3.msra.mxu1 %v2775_v1  ;;  %1972 = vmatprep.mubr.msk.f32.mxu1 %vm2465_vm0, %v2464_v0 }
 0x2dc   :  { %1970 = vmatprep.subr.mxu1 %v2464_v0  ;;  %v705_v31 = vpop.f32.mrf.mxu0 }
 0x2dd   :  { %1205 = vrot.lane.b32.xlu1 %v525_v62, %s2468_s24  ;;  %907 = vrot.lane.b32.xlu0 %v525_v62, %s2469_s25 }
 0x2de   :  { %1971 = vmatpush3.msra.mxu1 %v2778_v2  ;;  %v1964_v43 = vpop.f32.mrf.mxu0 }
 0x2df   :  { %2010 = vmatprep.subr.mxu1 %v2464_v0 }
 0x2e0   :  { %v715_v44 = vpop.f32.mrf.mxu0 }
 0x2e1   :  { %1503 = vrot.lane.b32.xlu1 %v525_v62, %s2470_s27  ;;  %1354 = vrot.lane.b32.xlu0 %v525_v62, %s2471_s7 }
 0x2e2   :  { %v2995_v45 = vpop.f32.mrf.mxu0 }
 0x2e4   :  { %v2997_v46 = vpop.f32.mrf.mxu0 }
 0x34b   :  { %v754_v17 = vpop.permute.xlu0 %753  ;;  %v1057_v40 = vpop.permute.xlu1 %1056 }
 0x34c   :  { %1973 = vmatmul.mubr.msk.f32.vlgmr.msra.gmra.mxu1 %vm258_vm2, %v754_v17 }
 0x34d   :  { %2011 = vmatpush3.msra.mxu1 %v2775_v1  ;;  %2014 = vmatprep.mubr.msk.f32.mxu1 %vm2465_vm0, %v2464_v0 }
 0x34e   :  { %2012 = vmatprep.subr.mxu1 %v2464_v0 }
 0x34f   :  { %v908_v18 = vpop.permute.xlu0 %907  ;;  %2013 = vmatpush3.msra.mxu1 %v2778_v2  ;;  %v1206_v42 = vpop.permute.xlu1 %1205 }
 0x350   :  { %2015 = vmatmul.mubr.msk.f32.vlgmr.msra.gmra.mxu1 %vm258_vm2, %v908_v18  ;;  %2017 = vmatprep.subr.mxu1 %v2464_v0 }
 0x351   :  { %2018 = vmatpush3.msra.mxu1 %v2785_v3  ;;  %2049 = vmatprep.mubr.msk.f32.mxu1 %vm2465_vm0, %v2464_v0 }
 0x352   :  { %2019 = vmatprep.subr.mxu1 %v2464_v0 }
 0x353   :  { %2020 = vmatpush3.msra.mxu1 %v2787_v4  ;;  %v1355_v6 = vpop.permute.xlu0 %1354  ;;  %v1504_v8 = vpop.permute.xlu1 %1503 }
 0x354   :  { %2021 = vmatprep.subr.mxu1 %v2464_v0 }
 0x355   :  { %2022 = vmatpush3.msra.mxu1 %v2791_v5 }
 0x356   :  { %2023 = vmatprep.subr.mxu1 %v2464_v0 }
 0x357   :  { %2024 = vmatpush3.msra.mxu1 %v2798_v7 }
 0x358   :  { %2025 = vmatprep.subr.mxu1 %v2464_v0 }
 0x359   :  { %2026 = vmatpush3.msra.mxu1 %v2806_v9 }
 0x35a   :  { %2027 = vmatprep.subr.mxu1 %v2464_v0 }
 0x35b   :  { %2028 = vmatpush3.msra.mxu1 %v2811_v10 }
 0x35c   :  { %2029 = vmatprep.subr.mxu1 %v2464_v0 }
 0x35d   :  { %2030 = vmatpush3.msra.mxu1 %v2815_v11 }
 0x35e   :  { %2031 = vmatprep.subr.mxu1 %v2464_v0 }
 0x35f   :  { %2032 = vmatpush3.msra.mxu1 %v2819_v12 }
 0x360   :  { %2033 = vmatprep.subr.mxu1 %v2464_v0 }
 0x361   :  { %2034 = vmatpush3.msra.mxu1 %v2823_v13 }
 0x362   :  { %2035 = vmatprep.subr.mxu1 %v2464_v0 }
 0x363   :  { %2036 = vmatpush3.msra.mxu1 %v2827_v14 }
 0x364   :  { %2037 = vmatprep.subr.mxu1 %v2464_v0 }
 0x365   :  { %2038 = vmatpush3.msra.mxu1 %v2831_v15 }
 0x366   :  { %2039 = vmatprep.subr.mxu1 %v2464_v0 }
 0x367   :  { %2040 = vmatpush3.msra.mxu1 %v2835_v16 }
 0x368   :  { %2041 = vmatprep.subr.mxu1 %v2464_v0 }
 0x369   :  { %2042 = vmatpush3.msra.mxu1 %v2875_v19 }
 0x36a   :  { %2043 = vmatprep.subr.mxu1 %v2464_v0 }
 0x36b   :  { %2044 = vmatpush3.msra.mxu1 %v2883_v21 }
 0x36c   :  { %2045 = vmatprep.subr.mxu1 %v2464_v0 }
 0x36d   :  { %2046 = vmatpush3.msra.mxu1 %v2893_v23 }
 0x36e   :  { %2047 = vmatprep.subr.mxu1 %v2464_v0 }
 0x36f   :  { %2048 = vmatpush3.msra.mxu1 %v2899_v24 }
 0x370   :  { %2094 = vmatprep.subr.mxu1 %v2464_v0 }
 0x39a   :  { %v609_v25 = vpop.f32.mrf.mxu1 }
 0x39b   :  { %v2909_v29 = vadd.f32 %v1667_v27, %v609_v25 }
 0x39c   :  { %v1956_v26 = vpop.f32.mrf.mxu1 }
 0x40c   :  { %v823_v30 = vpop.f32.mrf.mxu1 }
 0x40d   :  { %v827_v32 = vadd.f32 %v823_v30, %v2909_v29 }
 0x40e   :  { %v1974_v33 = vpop.f32.mrf.mxu1 }
 0x40f   :  { %v828_v34 = vadd.f32 %v827_v32, %v705_v31 }
 0x410   :  { %v977_v35 = vpop.f32.mrf.mxu1 }
 0x411   :  { %v829_v36 = vmax.f32 %v828_v34, 0.0  ;;  %v981_v37 = vadd.f32 %v977_v35, %v2909_v29 }
 0x412   :  { %v2016_v38 = vpop.f32.mrf.mxu1 }
 0x413   :  { %v982_v39 = vadd.f32 %v1961_v28, %v981_v37  ;;  %2008 = vmatmul.mubr.f32.vlgmr.msra.gmra.mxu0 %v829_v36 }
 0x414   :  { %2053 = vmatpush3.msra.mxu0 %v2775_v1  ;;  %2056 = vmatprep.mubr.msk.f32.mxu0 %vm2465_vm0, %v2464_v0 }
 0x415   :  { %v983_v41 = vmax.f32 %v982_v39, 0.0  ;;  %2054 = vmatprep.subr.mxu0 %v2464_v0 }
 0x416   :  { %2055 = vmatpush3.msra.mxu0 %v2778_v2 }
 0x417   :  { %2050 = vmatmul.mubr.f32.vlgmr.msra.gmra.mxu1 %v983_v41  ;;  %2057 = vmatmul.mubr.msk.f32.vlgmr.msra.gmra.mxu0 %vm258_vm2, %v1057_v40 }
 0x418   :  { %2095 = vmatpush3.msra.mxu1 %v2775_v1  ;;  %2098 = vmatprep.mubr.msk.f32.mxu1 %vm2465_vm0, %v2464_v0 }
 0x419   :  { %2096 = vmatprep.subr.mxu1 %v2464_v0  ;;  %2059 = vmatprep.subr.mxu0 %v2464_v0 }
 0x41a   :  { %2097 = vmatpush3.msra.mxu1 %v2778_v2  ;;  %2060 = vmatpush3.msra.mxu0 %v2785_v3 }
 0x41b   :  { %2099 = vmatmul.mubr.msk.f32.vlgmr.msra.gmra.mxu1 %vm258_vm2, %v1206_v42  ;;  %2061 = vmatprep.subr.mxu0 %v2464_v0 }
 0x41c   :  { %2062 = vmatpush3.msra.mxu0 %v2787_v4  ;;  %2101 = vmatprep.subr.mxu1 %v2464_v0 }
 0x41d   :  { %2063 = vmatprep.subr.mxu0 %v2464_v0  ;;  %2102 = vmatpush3.msra.mxu1 %v2785_v3 }
 0x41e   :  { %2064 = vmatpush3.msra.mxu0 %v2791_v5  ;;  %2103 = vmatprep.subr.mxu1 %v2464_v0 }
 0x41f   :  { %2065 = vmatprep.subr.mxu0 %v2464_v0  ;;  %2104 = vmatpush3.msra.mxu1 %v2787_v4 }
 0x420   :  { %2066 = vmatpush3.msra.mxu0 %v2798_v7  ;;  %2105 = vmatprep.subr.mxu1 %v2464_v0 }
 0x421   :  { %2067 = vmatprep.subr.mxu0 %v2464_v0  ;;  %2106 = vmatpush3.msra.mxu1 %v2791_v5 }
 0x422   :  { %2068 = vmatpush3.msra.mxu0 %v2806_v9  ;;  %2107 = vmatprep.subr.mxu1 %v2464_v0 }
 0x423   :  { %2069 = vmatprep.subr.mxu0 %v2464_v0  ;;  %2108 = vmatpush3.msra.mxu1 %v2798_v7 }
 0x424   :  { %2070 = vmatpush3.msra.mxu0 %v2811_v10  ;;  %2109 = vmatprep.subr.mxu1 %v2464_v0 }
 0x425   :  { %2071 = vmatprep.subr.mxu0 %v2464_v0  ;;  %2110 = vmatpush3.msra.mxu1 %v2806_v9 }
 0x426   :  { %2072 = vmatpush3.msra.mxu0 %v2815_v11  ;;  %2111 = vmatprep.subr.mxu1 %v2464_v0 }
 0x427   :  { %2073 = vmatprep.subr.mxu0 %v2464_v0  ;;  %2112 = vmatpush3.msra.mxu1 %v2811_v10 }
 0x428   :  { %2074 = vmatpush3.msra.mxu0 %v2819_v12  ;;  %2113 = vmatprep.subr.mxu1 %v2464_v0 }
 0x429   :  { %2075 = vmatprep.subr.mxu0 %v2464_v0  ;;  %2114 = vmatpush3.msra.mxu1 %v2815_v11 }
 0x42a   :  { %2076 = vmatpush3.msra.mxu0 %v2823_v13  ;;  %2115 = vmatprep.subr.mxu1 %v2464_v0 }
 0x42b   :  { %2077 = vmatprep.subr.mxu0 %v2464_v0  ;;  %2116 = vmatpush3.msra.mxu1 %v2819_v12 }
 0x42c   :  { %2078 = vmatpush3.msra.mxu0 %v2827_v14  ;;  %2117 = vmatprep.subr.mxu1 %v2464_v0 }
 0x42d   :  { %2079 = vmatprep.subr.mxu0 %v2464_v0  ;;  %2118 = vmatpush3.msra.mxu1 %v2823_v13 }
 0x42e   :  { %2080 = vmatpush3.msra.mxu0 %v2831_v15  ;;  %2119 = vmatprep.subr.mxu1 %v2464_v0 }
 0x42f   :  { %2081 = vmatprep.subr.mxu0 %v2464_v0  ;;  %2120 = vmatpush3.msra.mxu1 %v2827_v14 }
 0x430   :  { %2082 = vmatpush3.msra.mxu0 %v2835_v16  ;;  %2121 = vmatprep.subr.mxu1 %v2464_v0 }
 0x431   :  { %2083 = vmatprep.subr.mxu0 %v2464_v0  ;;  %2122 = vmatpush3.msra.mxu1 %v2831_v15 }
 0x432   :  { %2084 = vmatpush3.msra.mxu0 %v2875_v19  ;;  %2123 = vmatprep.subr.mxu1 %v2464_v0 }
 0x433   :  { %2085 = vmatprep.subr.mxu0 %v2464_v0  ;;  %2124 = vmatpush3.msra.mxu1 %v2835_v16 }
 0x434   :  { %2086 = vmatpush3.msra.mxu0 %v2883_v21  ;;  %2125 = vmatprep.subr.mxu1 %v2464_v0 }
 0x435   :  { %2087 = vmatprep.subr.mxu0 %v2464_v0  ;;  %2126 = vmatpush3.msra.mxu1 %v2875_v19 }
 0x436   :  { %2088 = vmatpush3.msra.mxu0 %v2893_v23  ;;  %2127 = vmatprep.subr.mxu1 %v2464_v0 }
 0x437   :  { %2089 = vmatprep.subr.mxu0 %v2464_v0  ;;  %2091 = vmatprep.mubr.msk.f32.mxu0 %vm2465_vm0, %v2464_v0 }
 0x438   :  { %2090 = vmatpush3.msra.mxu0 %v2899_v24  ;;  %2128 = vmatpush3.msra.mxu1 %v2883_v21 }
 0x439   :  { %2129 = vmatprep.subr.mxu1 %v2464_v0  ;;  %2136 = vmatprep.subr.mxu0 %v2464_v0 }
 0x43a   :  { %2130 = vmatpush3.msra.mxu1 %v2893_v23  ;;  %2133 = vmatprep.mubr.msk.f32.mxu1 %vm2465_vm0, %v2464_v0 }
 0x43b   :  { %2131 = vmatprep.subr.mxu1 %v2464_v0 }
 0x43c   :  { %2132 = vmatpush3.msra.mxu1 %v2899_v24 }
 0x43d   :  { %2178 = vmatprep.subr.mxu1 %v2464_v0 }
 0x4d3   :  { %v902_v48 = vpop.f32.mrf.mxu0 }
 0x4d4   :  { %v903_v49 = vadd.f32 %v2999_v47, %v902_v48 }
 0x4d5   :  { %v2009_v50 = vpop.f32.mrf.mxu0 }
 0x4d6   :  { %906 = vst [vmem:[%s3127_s16] sm:$0xff] %v903_v49 }
 0x4d7   :  { %v1050_v51 = vpop.f32.mrf.mxu1  ;;  %v1126_v52 = vpop.f32.mrf.mxu0 }
 0x4d8   :  { %v1051_v53 = vadd.f32 %v2999_v47, %v1050_v51  ;;  %v1130_v54 = vadd.f32 %v1126_v52, %v2909_v29 }
 0x4d9   :  { %v2051_v55 = vpop.f32.mrf.mxu1  ;;  %v2058_v56 = vpop.f32.mrf.mxu0 }
 0x4da   :  { %1678 = vst [vmem:[%s3127_s16 + $0x8] sm:$0xff] %v1051_v53  ;;  %v1131_v57 = vadd.f32 %v1130_v54, %v715_v44 }
 0x4db   :  { %v1275_v58 = vpop.f32.mrf.mxu1 }
 0x4dc   :  { %v1132_v59 = vmax.f32 %v1131_v57, 0.0  ;;  %v1279_v60 = vadd.f32 %v1275_v58, %v2909_v29 }
 0x4dd   :  { %v2100_v61 = vpop.f32.mrf.mxu1 }
 0x4de   :  { %v1280_v62 = vadd.f32 %v1964_v43, %v1279_v60  ;;  %2092 = vmatmul.mubr.f32.vlgmr.msra.gmra.mxu0 %v1132_v59 }
 0x4df   :  { %2137 = vmatpush3.msra.mxu0 %v2775_v1  ;;  %2140 = vmatprep.mubr.msk.f32.mxu0 %vm2465_vm0, %v2464_v0 }
 0x4e0   :  { %v1281_v63 = vmax.f32 %v1280_v62, 0.0  ;;  %2138 = vmatprep.subr.mxu0 %v2464_v0 }
 0x4e1   :  { %2139 = vmatpush3.msra.mxu0 %v2778_v2 }
 0x4e2   :  { %2134 = vmatmul.mubr.f32.vlgmr.msra.gmra.mxu1 %v1281_v63  ;;  %2141 = vmatmul.mubr.msk.f32.vlgmr.msra.gmra.mxu0 %vm258_vm2, %v1355_v6 }
 0x4e3   :  { %2179 = vmatpush3.msra.mxu1 %v2775_v1  ;;  %2182 = vmatprep.mubr.msk.f32.mxu1 %vm2465_vm0, %v2464_v0 }
 0x4e4   :  { %2180 = vmatprep.subr.mxu1 %v2464_v0  ;;  %2143 = vmatprep.subr.mxu0 %v2464_v0 }
 0x4e5   :  { %2181 = vmatpush3.msra.mxu1 %v2778_v2  ;;  %2144 = vmatpush3.msra.mxu0 %v2785_v3 }
 0x4e6   :  { %2183 = vmatmul.mubr.msk.f32.vlgmr.msra.gmra.mxu1 %vm258_vm2, %v1504_v8  ;;  %2145 = vmatprep.subr.mxu0 %v2464_v0 }
 0x4e7   :  { %2146 = vmatpush3.msra.mxu0 %v2787_v4  ;;  %2185 = vmatprep.subr.mxu1 %v2464_v0 }
 0x4e8   :  { %2147 = vmatprep.subr.mxu0 %v2464_v0  ;;  %2186 = vmatpush3.msra.mxu1 %v2785_v3 }
 0x4e9   :  { %2148 = vmatpush3.msra.mxu0 %v2791_v5  ;;  %2187 = vmatprep.subr.mxu1 %v2464_v0 }
 0x4ea   :  { %2149 = vmatprep.subr.mxu0 %v2464_v0  ;;  %2188 = vmatpush3.msra.mxu1 %v2787_v4 }
 0x4eb   :  { %2150 = vmatpush3.msra.mxu0 %v2798_v7  ;;  %2189 = vmatprep.subr.mxu1 %v2464_v0 }
 0x4ec   :  { %2151 = vmatprep.subr.mxu0 %v2464_v0  ;;  %2190 = vmatpush3.msra.mxu1 %v2791_v5 }
 0x4ed   :  { %2152 = vmatpush3.msra.mxu0 %v2806_v9  ;;  %2191 = vmatprep.subr.mxu1 %v2464_v0 }
 0x4ee   :  { %2153 = vmatprep.subr.mxu0 %v2464_v0  ;;  %2192 = vmatpush3.msra.mxu1 %v2798_v7 }
 0x4ef   :  { %2154 = vmatpush3.msra.mxu0 %v2811_v10  ;;  %2193 = vmatprep.subr.mxu1 %v2464_v0 }
 0x4f0   :  { %2155 = vmatprep.subr.mxu0 %v2464_v0  ;;  %2194 = vmatpush3.msra.mxu1 %v2806_v9 }
 0x4f1   :  { %2156 = vmatpush3.msra.mxu0 %v2815_v11  ;;  %2195 = vmatprep.subr.mxu1 %v2464_v0 }
 0x4f2   :  { %2157 = vmatprep.subr.mxu0 %v2464_v0  ;;  %2196 = vmatpush3.msra.mxu1 %v2811_v10 }
 0x4f3   :  { %2158 = vmatpush3.msra.mxu0 %v2819_v12  ;;  %2197 = vmatprep.subr.mxu1 %v2464_v0 }
 0x4f4   :  { %2159 = vmatprep.subr.mxu0 %v2464_v0  ;;  %2198 = vmatpush3.msra.mxu1 %v2815_v11 }
 0x4f5   :  { %2160 = vmatpush3.msra.mxu0 %v2823_v13  ;;  %2199 = vmatprep.subr.mxu1 %v2464_v0 }
 0x4f6   :  { %2161 = vmatprep.subr.mxu0 %v2464_v0  ;;  %2200 = vmatpush3.msra.mxu1 %v2819_v12 }
 0x4f7   :  { %2162 = vmatpush3.msra.mxu0 %v2827_v14  ;;  %2201 = vmatprep.subr.mxu1 %v2464_v0 }
 0x4f8   :  { %2163 = vmatprep.subr.mxu0 %v2464_v0  ;;  %2202 = vmatpush3.msra.mxu1 %v2823_v13 }
 0x4f9   :  { %2164 = vmatpush3.msra.mxu0 %v2831_v15  ;;  %2203 = vmatprep.subr.mxu1 %v2464_v0 }
 0x4fa   :  { %2165 = vmatprep.subr.mxu0 %v2464_v0  ;;  %2204 = vmatpush3.msra.mxu1 %v2827_v14 }
 0x4fb   :  { %2166 = vmatpush3.msra.mxu0 %v2835_v16  ;;  %2205 = vmatprep.subr.mxu1 %v2464_v0 }
 0x4fc   :  { %2167 = vmatprep.subr.mxu0 %v2464_v0  ;;  %2206 = vmatpush3.msra.mxu1 %v2831_v15 }
 0x4fd   :  { %2168 = vmatpush3.msra.mxu0 %v2875_v19  ;;  %2207 = vmatprep.subr.mxu1 %v2464_v0 }
 0x4fe   :  { %2169 = vmatprep.subr.mxu0 %v2464_v0  ;;  %2208 = vmatpush3.msra.mxu1 %v2835_v16 }
 0x4ff   :  { %2170 = vmatpush3.msra.mxu0 %v2883_v21  ;;  %2209 = vmatprep.subr.mxu1 %v2464_v0 }
 0x500   :  { %2171 = vmatprep.subr.mxu0 %v2464_v0  ;;  %2210 = vmatpush3.msra.mxu1 %v2875_v19 }
 0x501   :  { %2172 = vmatpush3.msra.mxu0 %v2893_v23  ;;  %2211 = vmatprep.subr.mxu1 %v2464_v0 }
 0x502   :  { %2173 = vmatprep.subr.mxu0 %v2464_v0  ;;  %2175 = vmatprep.mubr.msk.f32.mxu0 %vm2465_vm0, %v2464_v0 }
 0x503   :  { %2174 = vmatpush3.msra.mxu0 %v2899_v24  ;;  %2212 = vmatpush3.msra.mxu1 %v2883_v21 }
 0x504   :  { %2213 = vmatprep.subr.mxu1 %v2464_v0  ;;  %2217 = vmatprep.mubr.msk.f32.mxu1 %vm2465_vm0, %v2464_v0 }
 0x505   :  { %2214 = vmatpush3.msra.mxu1 %v2893_v23 }
 0x506   :  { %2215 = vmatprep.subr.mxu1 %v2464_v0 }
 0x507   :  { %2216 = vmatpush3.msra.mxu1 %v2899_v24 }
 0x59e   :  { %v1199_v1 = vpop.f32.mrf.mxu0 }
 0x59f   :  { %v1200_v2 = vadd.f32 %v2999_v47, %v1199_v1 }
 0x5a0   :  { %v2093_v3 = vpop.f32.mrf.mxu0 }
 0x5a1   :  { %1680 = vst [vmem:[%s3127_s16 + $0x10] sm:$0xff] %v1200_v2 }
 0x5a2   :  { %v1348_v4 = vpop.f32.mrf.mxu1  ;;  %v1424_v5 = vpop.f32.mrf.mxu0 }
 0x5a3   :  { %v1349_v7 = vadd.f32 %v2999_v47, %v1348_v4  ;;  %v1428_v9 = vadd.f32 %v1424_v5, %v2909_v29 }
 0x5a4   :  { %v2135_v10 = vpop.f32.mrf.mxu1  ;;  %v2142_v11 = vpop.f32.mrf.mxu0 }
 0x5a5   :  { %1682 = vst [vmem:[%s3127_s16 + $0x18] sm:$0xff] %v1349_v7  ;;  %v1429_v0 = vadd.f32 %v1428_v9, %v2997_v46 }
 0x5a6   :  { %v1573_v12 = vpop.f32.mrf.mxu1 }
 0x5a7   :  { %v1430_v13 = vmax.f32 %v1429_v0, 0.0  ;;  %v1577_v14 = vadd.f32 %v1573_v12, %v2909_v29 }
 0x5a8   :  { %v2184_v15 = vpop.f32.mrf.mxu1 }
 0x5a9   :  { %v1578_v16 = vadd.f32 %v2995_v45, %v1577_v14  ;;  %2176 = vmatmul.mubr.f32.vlgmr.msra.gmra.mxu0 %v1430_v13 }
 0x5ab   :  { %v1579_v17 = vmax.f32 %v1578_v16, 0.0 }
 0x5ad   :  { %2218 = vmatmul.mubr.f32.vlgmr.msra.gmra.mxu1 %v1579_v17 }
 0x669   :  { %v1497_v18 = vpop.f32.mrf.mxu0 }
 0x66a   :  { %v1498_v19 = vadd.f32 %v2999_v47, %v1497_v18 }
 0x66b   :  { %v2177_v20 = vpop.f32.mrf.mxu0 }
 0x66c   :  { %1684 = vst [vmem:[%s3127_s16 + $0x20] sm:$0xff] %v1498_v19 }
 0x66d   :  { %v1646_v21 = vpop.f32.mrf.mxu1 }
 0x66e   :  { %v1647_v22 = vadd.f32 %v2999_v47, %v1646_v21 }
 0x66f   :  { %v2219_v23 = vpop.f32.mrf.mxu1 }
 0x670   :  { %1686 = vst [vmem:[%s3127_s16 + $0x28] sm:$0xff] %v1647_v22 }
 0x671   :  { %1656 = vsyncpa [#allocation3], 1 }
 0x672   :  { %1657 = vsyncpa [#allocation5], 1 }
 0x673   :  { %1658 = vsyncpa [#allocation8], 1 }
 0x674   :  { %1659 = vsyncpa [#allocation11], 1 }
 0x675   :  { %1660 = vsyncpa [#allocation14], 1 }
 0x676   :  { %1661 = vsyncpa [#allocation17], 1 }

</bundles_post_ra>
